<compile_context>
chip_gen: v6e
topology: v6e:2x2x1
jax: 0.10.0
libtpu: 0.0.40
codegen_flags: <defaults>
</compile_context>

<pallas_src>
import jax
import jax.numpy as jnp
from jax.experimental import pallas as pl
from jax.experimental.pallas import tpu as pltpu


def _make_rc_kernel(leak: float, gamma: float, matmul_dtype):
    """Kernel body with leak/gamma baked in as static Python scalars."""
    c0 = (leak - 1.0) / gamma      # coefficient on r
    c1 = (1.0 - leak) / gamma      # coefficient on tanh(...)

    def rc_kernel(a_t_ref, b_ref, r0_ref, out_ref, state_ref):
        # state_ref : (B, N) VMEM scratch, persists across the time grid.
        @pl.when(pl.program_id(0) == 0)
        def _():
            state_ref[...] = r0_ref[...]

        r = state_ref[...]                                        # (B, N) f32
        # (A_eff @ r_col + b_eff) in the transposed layout:
        #   pre = r @ A_eff.T + b_eff.T     -> lane-dense (B, N) output tile.
        pre = jnp.dot(r.astype(matmul_dtype),
                      a_t_ref[...].astype(matmul_dtype),
                      preferred_element_type=jnp.float32) + b_ref[...]
        new_r = c0 * r + c1 * jnp.tanh(pre)                       # f32 tail
        state_ref[...] = new_r
        out_ref[0] = new_r

    return rc_kernel


def rc_autonomy_rollout(Win, A, b, Wout, c, r, *, leak: float, gamma: float,
                        steps: int, matmul_dtype=jnp.float32):
    """Apply the RC_autonomy forward map `steps` times inside ONE pallas_call.

    Shapes (PyTorch convention):
        Win  : (N, D)   A : (N, N)   b : (N, 1)
        Wout : (D, N)   c : (D, 1)   r : (N, B)
    Returns trajectory of shape (steps, N, B); entry [t] is the state after
    t+1 applications of the forward map (entry [0] == single forward output).
    """
    N, B = r.shape

    # --- fold the linear readout into the recurrence (done once, outside) ---
    A_eff = A + Win @ Wout                    # (N, N)
    b_eff = b + Win @ c                       # (N, 1)

    # --- lane-dense layout: batch on sublanes, reservoir dim on lanes ---
    A_eff_T = A_eff.T.astype(jnp.float32)     # (N, N)
    b_row = b_eff.T.astype(jnp.float32)       # (1, N)
    r_bn = r.T.astype(jnp.float32)            # (B, N)

    kernel = _make_rc_kernel(leak, gamma, matmul_dtype)

    traj = pl.pallas_call(
        kernel,
        out_shape=jax.ShapeDtypeStruct((steps, B, N), jnp.float32),
        grid_spec=pltpu.PrefetchScalarGridSpec(
            num_scalar_prefetch=0,
            grid=(steps,),
            in_specs=[
                # Constant index maps -> weights/bias/initial-state stay
                # resident in VMEM across all time steps (no re-DMA).
                pl.BlockSpec((N, N), lambda t: (0, 0)),   # A_eff.T
                pl.BlockSpec((1, N), lambda t: (0, 0)),   # b_eff.T
                pl.BlockSpec((B, N), lambda t: (0, 0)),   # r0
            ],
            out_specs=pl.BlockSpec((1, B, N), lambda t: (t, 0, 0)),
            scratch_shapes=[pltpu.VMEM((B, N), jnp.float32)],   # carried state
        ),
        compiler_params=pltpu.CompilerParams(
            dimension_semantics=("arbitrary",),   # loop-carried time axis
        ),
    )(A_eff_T, b_row, r_bn)

    # Back to the PyTorch (N, B) convention.
    return jnp.transpose(traj, (0, 2, 1))


def rc_autonomy_forward(Win, A, b, Wout, c, r, *, leak: float, gamma: float,
                        matmul_dtype=jnp.float32):
    """Single forward step (exact semantics of RC_autonomy.forward)."""
    return rc_autonomy_rollout(Win, A, b, Wout, c, r, leak=leak, gamma=gamma,
                               steps=1, matmul_dtype=matmul_dtype)[0]


def rc_autonomy_reference(Win, A, b, Wout, c, r, *, leak: float, gamma: float):
    """Plain-JAX reference mirroring the PyTorch forward (unfolded)."""
    x = Wout @ r + c
    return (leak - 1.0) / gamma * r + (1.0 - leak) / gamma * jnp.tanh(
        Win @ x + A @ r + b)


def rc_autonomy_rollout_reference(Win, A, b, Wout, c, r, *, leak, gamma, steps):
    outs = []
    for _ in range(steps):
        r = rc_autonomy_reference(Win, A, b, Wout, c, r, leak=leak, gamma=gamma)
        outs.append(r)
    return jnp.stack(outs)


if __name__ == "__main__":
    # Small, deterministic problem sizes.
    N = 128     # reservoir size (lane dim inside the kernel)
    D = 4       # readout output dim (Win's input dim)
    B = 8       # batch / number of reservoir-state columns (sublane dim)
    leak = 0.9

    key = jax.random.PRNGKey(0)
    k_win, k_a, k_b, k_wout, k_c, k_r = jax.random.split(key, 6)

    Win = 0.1 * jax.random.normal(k_win, (N, D), dtype=jnp.float32)
    A = 0.05 * jax.random.normal(k_a, (N, N), dtype=jnp.float32)
    b = 0.1 * jax.random.normal(k_b, (N, 1), dtype=jnp.float32)
    # Deterministic stand-in for the (externally fitted sklearn) linear readout.
    Wout = 0.1 * jax.random.normal(k_wout, (D, N), dtype=jnp.float32)
    c = 0.1 * jax.random.normal(k_c, (D, 1), dtype=jnp.float32)
    r = jax.random.normal(k_r, (N, B), dtype=jnp.float32)

    # --- single forward step (module semantics), gamma = dt = 0.01 ---
    dt = 0.01
    out = rc_autonomy_forward(Win, A, b, Wout, c, r, leak=leak, gamma=dt)
    out = jax.block_until_ready(out)
    ref = rc_autonomy_reference(Win, A, b, Wout, c, r, leak=leak, gamma=dt)
    assert out.shape == (N, B)
    assert jnp.allclose(out, ref, rtol=1e-5, atol=1e-5), "single-step mismatch"

    # --- multi-step rollout inside one pallas_call (weights resident) ---
    # Use gamma such that repeated application of the map stays bounded.
    T, gamma_roll = 16, 1.0
    traj = rc_autonomy_rollout(Win, A, b, Wout, c, r,
                               leak=leak, gamma=gamma_roll, steps=T)
    traj = jax.block_until_ready(traj)
    traj_ref = rc_autonomy_rollout_reference(Win, A, b, Wout, c, r,
                                             leak=leak, gamma=gamma_roll,
                                             steps=T)
    assert traj.shape == (T, N, B)
    assert jnp.allclose(traj, traj_ref, rtol=1e-4, atol=1e-4), "rollout mismatch"

    print("KERNEL_OK")
</pallas_src>

<mosaic_0001>
module attributes {stable_mosaic.version = 11 : i64} {
  func.func @rc_kernel(%arg0: i32, %arg1: memref<128x128xf32, #tpu.memory_space<vmem>>, %arg2: memref<1x128xf32, #tpu.memory_space<vmem>>, %arg3: memref<8x128xf32, #tpu.memory_space<vmem>>, %arg4: memref<1x8x128xf32, #tpu.memory_space<vmem>>, %arg5: memref<8x128xf32, #tpu.memory_space<vmem>>) attributes {dimension_semantics = [#tpu.dimension_semantics<arbitrary>], iteration_bounds = array<i64: 1>, scalar_prefetch = 0 : i64, scratch_operands = 1 : i64, tpu.core_type = #tpu.core_type<tc>, window_params = [{pipeline_mode = #tpu.pipeline_mode<synchronous>, transform_indices = @transform_0, window_bounds = array<i64: 128, 128>}, {pipeline_mode = #tpu.pipeline_mode<synchronous>, transform_indices = @transform_1, window_bounds = array<i64: 1, 128>}, {pipeline_mode = #tpu.pipeline_mode<synchronous>, transform_indices = @transform_2, window_bounds = array<i64: 8, 128>}, {transform_indices = @transform_3, window_bounds = array<i64: 1, 8, 128>}]} {
    %c0_i32 = arith.constant 0 : i32
    %0 = arith.cmpi eq, %arg0, %c0_i32 : i32
    %1 = arith.extui %0 : i1 to i32
    %c0_i32_0 = arith.constant 0 : i32
    %2 = arith.cmpi ne, %1, %c0_i32_0 : i32
    scf.if %2 {
      %c0_13 = arith.constant 0 : index
      %c0_14 = arith.constant 0 : index
      %19 = vector.load %arg3[%c0_13, %c0_14] : memref<8x128xf32, #tpu.memory_space<vmem>>, vector<8x128xf32>
      %c0_15 = arith.constant 0 : index
      %c0_16 = arith.constant 0 : index
      %20 = vector.load %arg5[%c0_15, %c0_16] : memref<8x128xf32, #tpu.memory_space<vmem>>, vector<8x128xf32>
      tpu.vector_store %arg5[%c0_15, %c0_16], %19 {strides = array<i32>} : memref<8x128xf32, #tpu.memory_space<vmem>>, vector<8x128xf32>,
    } else {
    }
    %c0 = arith.constant 0 : index
    %c0_1 = arith.constant 0 : index
    %3 = vector.load %arg5[%c0, %c0_1] : memref<8x128xf32, #tpu.memory_space<vmem>>, vector<8x128xf32>
    %c0_2 = arith.constant 0 : index
    %c0_3 = arith.constant 0 : index
    %4 = vector.load %arg1[%c0_2, %c0_3] : memref<128x128xf32, #tpu.memory_space<vmem>>, vector<128x128xf32>
    %cst = arith.constant dense<0.000000e+00> : vector<8x128xf32>
    %5 = tpu.matmul %3, %4, %cst {dimension_numbers = #tpu.dot_dimension_numbers<[1], [0], [0], [1], [0, 0, 1, 1], [], []>} : vector<8x128xf32>, vector<128x128xf32>, vector<8x128xf32> -> vector<8x128xf32>
    %c0_4 = arith.constant 0 : index
    %c0_5 = arith.constant 0 : index
    %6 = vector.load %arg2[%c0_4, %c0_5] : memref<1x128xf32, #tpu.memory_space<vmem>>, vector<1x128xf32>
    %7 = vector.broadcast %6 : vector<1x128xf32> to vector<8x128xf32>
    %8 = arith.addf %5, %7 : vector<8x128xf32>
    %cst_6 = arith.constant -1.000000e+01 : f32
    %9 = vector.broadcast %cst_6 : f32 to vector<8x128xf32>
    %10 = arith.mulf %9, %3 : vector<8x128xf32>
    %11 = math.tanh %8 : vector<8x128xf32>
    %cst_7 = arith.constant 1.000000e+01 : f32
    %12 = vector.broadcast %cst_7 : f32 to vector<8x128xf32>
    %13 = arith.mulf %12, %11 : vector<8x128xf32>
    %14 = arith.addf %10, %13 : vector<8x128xf32>
    %c0_8 = arith.constant 0 : index
    %c0_9 = arith.constant 0 : index
    %15 = vector.load %arg5[%c0_8, %c0_9] : memref<8x128xf32, #tpu.memory_space<vmem>>, vector<8x128xf32>
    tpu.vector_store %arg5[%c0_8, %c0_9], %14 {strides = array<i32>} : memref<8x128xf32, #tpu.memory_space<vmem>>, vector<8x128xf32>,
    %c0_10 = arith.constant 0 : index
    %c0_11 = arith.constant 0 : index
    %c0_12 = arith.constant 0 : index
    %16 = vector.load %arg4[%c0_10, %c0_11, %c0_12] : memref<1x8x128xf32, #tpu.memory_space<vmem>>, vector<1x8x128xf32>
    %17 = vector.shape_cast %16 : vector<1x8x128xf32> to vector<8x128xf32>
    %18 = vector.shape_cast %14 : vector<8x128xf32> to vector<1x8x128xf32>
    tpu.vector_store %arg4[%c0_10, %c0_11, %c0_12], %18 {strides = array<i32>} : memref<1x8x128xf32, #tpu.memory_space<vmem>>, vector<1x8x128xf32>,
    return
  }
  func.func @transform_0(%arg0: i32) -> (i32, i32) {
    %c0_i32 = arith.constant 0 : i32
    %c0_i32_0 = arith.constant 0 : i32
    %c0_i32_1 = arith.constant 0 : i32
    return %c0_i32, %c0_i32_0 : i32, i32
  }
  func.func @transform_1(%arg0: i32) -> (i32, i32) {
    %c0_i32 = arith.constant 0 : i32
    %c0_i32_0 = arith.constant 0 : i32
    %c0_i32_1 = arith.constant 0 : i32
    return %c0_i32, %c0_i32_0 : i32, i32
  }
  func.func @transform_2(%arg0: i32) -> (i32, i32) {
    %c0_i32 = arith.constant 0 : i32
    %c0_i32_0 = arith.constant 0 : i32
    %c0_i32_1 = arith.constant 0 : i32
    return %c0_i32, %c0_i32_0 : i32, i32
  }
  func.func @transform_3(%arg0: i32) -> (i32, i32, i32) {
    %c0_i32 = arith.constant 0 : i32
    %c0_i32_0 = arith.constant 0 : i32
    %c0_i32_1 = arith.constant 0 : i32
    return %arg0, %c0_i32, %c0_i32_0 : i32, i32, i32
  }
}

</mosaic_0001>

<bundles_post_ra>
// kernel: tpu_custom_call.1
= control target key start
LH: loop header
LB: loop body
LE: loop exit
PB: predicated region body
PF: predicated region fallthrough
CT: control target
= control target key end

     0   :  { %8 = vsyncpa [#allocation4], 0  ;;  %s330_s0 = inlined_call_operand.hbm [shape: f32[128,128], index: 0, kind: input, shape index: {}]   ;;  %s331_s1 = inlined_call_operand.vmem [shape: f32[1,128], index: 1, kind: input, shape index: {}]   ;;  %s332_s2 = inlined_call_operand.hbm [shape: f32[8,128], index: 2, kind: input, shape index: {}]   ;;  %s333_s3 = inlined_call_operand.hbm [shape: f32[1,8,128], index: 3, kind: output, shape index: {}]  }
   0x1   :  { %9 = vsyncpa [#allocation7], 0 }
   0x2   :  { %10 = vsyncpa [#allocation5], 0  ;;  %s291_s12 = smov [#allocation3]  }
   0x3   :  { %s16_s13 = sshll.u32 %s291_s12, 4  ;;  %s17_s13 = int_to_ptr.vmem [resolvable:$true] %s16_s13 }
   0x4   :  { %s233_s14 = scalar_lea.vmem %s17_s13, 2048  ;;  %p238_p1 = scmp.lt.s32.totalorder %s17_s13, %s17_s13 }
   0x5   :  { %p234_p0 = scmp.ne.s32.totalorder %s17_s13, %s233_s14  ;;  %p239_p2 = scmp.lt.s32.totalorder %s233_s14, %s233_s14 }
   0x7   :  { %p240_p3 = por %p239_p2, %p238_p1 }
   0x9   :  { %p241_p4 = pnand %p240_p3, %p234_p0 }
   0xb   :  { %244 = shalt.err (!%p241_p4)
}
   0xc   :  { %s292_s15 = smov 128   ;;  %s293_s16 = smov 8  }
   0xd   :  { %22 = dma.hbm_to_vmem [thread:$0]  %s330_s0, 2048, %s17_s13, [#allocation4], %s292_s15, %s292_s15, %s293_s16  }
   0xe   :  { %s294_s19 = smov [#allocation6]  }
   0xf   :  { %s31_s20 = sshll.u32 %s294_s19, 4  ;;  %s32_s20 = int_to_ptr.vmem [resolvable:$true] %s31_s20 }
  0x10   :  { %s253_s21 = scalar_lea.vmem %s32_s20, 128  ;;  %p258_p6 = scmp.lt.s32.totalorder %s32_s20, %s32_s20 }
  0x11   :  { %p254_p5 = scmp.ne.s32.totalorder %s32_s20, %s253_s21  ;;  %p259_p7 = scmp.lt.s32.totalorder %s253_s21, %s253_s21 }
  0x13   :  { %p260_p8 = por %p259_p7, %p258_p6 }
  0x15   :  { %p261_p9 = pnand %p260_p8, %p254_p5 }
  0x17   :  { %264 = shalt.err (!%p261_p9)
}
  0x18   :  { %34 = dma.hbm_to_vmem [thread:$0]  %s332_s2, 128, %s32_s20, [#allocation7]  }
  0x19   :  { %285 = dma.done.wait [#allocation4], 2048  }
  0x1a   :  { %286 = vsyncadd [#allocation4], 4294965248 }
  0x1b   :  { %287 = dma.done.wait [#allocation7], 128  }
  0x1c   :  { %288 = vsyncadd [#allocation7], 4294967168  ;;  %v295_v0 = vmov 0.0   ;;  %vm296_vm0 = vmmov 0   ;;  %v63_v1 = vld [vmem:[#allocation3 + $0x78] sm:$0xff]  ;;  %v62_v2 = vld [vmem:[#allocation3 + $0x70] sm:$0xff] }
  0x1d   :  { %181 = vmatprep.subr.mxu0 %v295_v0  ;;  %213 = vmatprep.mubr.msk.f32.mxu0 %vm296_vm0, %v295_v0  ;;  %v61_v3 = vld [vmem:[#allocation3 + $0x68] sm:$0xff]  ;;  %v60_v4 = vld [vmem:[#allocation3 + $0x60] sm:$0xff]  ;;  %v59_v5 = vld [vmem:[#allocation3 + $0x58] sm:$0xff]  ;;  %s297_s24 = smov [#allocation8]  }
  0x1e   :  { %182 = vmatpush3.msra.mxu0 %v63_v1  ;;  %v58_v6 = vld [vmem:[#allocation3 + $0x50] sm:$0xff]  ;;  %v57_v7 = vld [vmem:[#allocation3 + $0x48] sm:$0xff]  ;;  %v56_v8 = vld [vmem:[#allocation3 + $0x40] sm:$0xff]  ;;  %s153_s25 = sshll.u32 %s297_s24, 4  ;;  %s154_s25 = int_to_ptr.vmem [resolvable:$true] %s153_s25 }
  0x1f   :  { %183 = vmatprep.subr.mxu0 %v295_v0  ;;  %v55_v9 = vld [vmem:[#allocation3 + $0x38] sm:$0xff]  ;;  %v54_v10 = vld [vmem:[#allocation3 + $0x30] sm:$0xff]  ;;  %v53_v11 = vld [vmem:[#allocation3 + $0x28] sm:$0xff]  ;;  %s265_s26 = scalar_lea.vmem %s154_s25, 128  ;;  %p270_p11 = scmp.lt.s32.totalorder %s154_s25, %s154_s25 }
  0x20   :  { %184 = vmatpush3.msra.mxu0 %v62_v2  ;;  %v52_v12 = vld [vmem:[#allocation3 + $0x20] sm:$0xff]  ;;  %v51_v13 = vld [vmem:[#allocation3 + $0x18] sm:$0xff]  ;;  %v50_v14 = vld [vmem:[#allocation3 + $0x10] sm:$0xff]  ;;  %p266_p10 = scmp.ne.s32.totalorder %s154_s25, %s265_s26  ;;  %p271_p12 = scmp.lt.s32.totalorder %s265_s26, %s265_s26 }
  0x21   :  { %185 = vmatprep.subr.mxu0 %v295_v0  ;;  %v49_v15 = vld [vmem:[#allocation3 + $0x8] sm:$0xff]  ;;  %v48_v16 = vld [vmem:[#allocation3] sm:$0xff] }
  0x22   :  { %186 = vmatpush3.msra.mxu0 %v61_v3  ;;  %v45_v17 = vld [vmem:[#allocation6] sm:$0xff]  ;;  %p272_p13 = por %p271_p12, %p270_p11 }
  0x23   :  { %187 = vmatprep.subr.mxu0 %v295_v0  ;;  %v163_v18 = vld [vmem:[%s331_s1] ss:$0 sm:$0xff]  ;;  %v141_v22 = vmul.f32 -10.0, %v45_v17 }
  0x24   :  { %188 = vmatpush3.msra.mxu0 %v60_v4  ;;  %p273_p0 = pnand %p272_p13, %p266_p10 }
  0x25   :  { %189 = vmatprep.subr.mxu0 %v295_v0 }
  0x26   :  { %190 = vmatpush3.msra.mxu0 %v59_v5 }
  0x27   :  { %191 = vmatprep.subr.mxu0 %v295_v0 }
  0x28   :  { %192 = vmatpush3.msra.mxu0 %v58_v6 }
  0x29   :  { %193 = vmatprep.subr.mxu0 %v295_v0 }
  0x2a   :  { %194 = vmatpush3.msra.mxu0 %v57_v7 }
  0x2b   :  { %195 = vmatprep.subr.mxu0 %v295_v0 }
  0x2c   :  { %196 = vmatpush3.msra.mxu0 %v56_v8 }
  0x2d   :  { %197 = vmatprep.subr.mxu0 %v295_v0 }
  0x2e   :  { %198 = vmatpush3.msra.mxu0 %v55_v9 }
  0x2f   :  { %199 = vmatprep.subr.mxu0 %v295_v0 }
  0x30   :  { %200 = vmatpush3.msra.mxu0 %v54_v10 }
  0x31   :  { %201 = vmatprep.subr.mxu0 %v295_v0 }
  0x32   :  { %202 = vmatpush3.msra.mxu0 %v53_v11 }
  0x33   :  { %203 = vmatprep.subr.mxu0 %v295_v0 }
  0x34   :  { %204 = vmatpush3.msra.mxu0 %v52_v12 }
  0x35   :  { %205 = vmatprep.subr.mxu0 %v295_v0 }
  0x36   :  { %206 = vmatpush3.msra.mxu0 %v51_v13 }
  0x37   :  { %207 = vmatprep.subr.mxu0 %v295_v0 }
  0x38   :  { %208 = vmatpush3.msra.mxu0 %v50_v14 }
  0x39   :  { %209 = vmatprep.subr.mxu0 %v295_v0 }
  0x3a   :  { %210 = vmatpush3.msra.mxu0 %v49_v15 }
  0x3b   :  { %211 = vmatprep.subr.mxu0 %v295_v0 }
  0x3c   :  { %212 = vmatpush3.msra.mxu0 %v48_v16 }
  0x3d   :  { %214 = vmatmul.mubr.f32.vlgmr.msra.gmra.mxu0 %v45_v17 }
  0xfd   :  { %v137_v19 = vpop.f32.mrf.mxu0 }
  0xfe   :  { %v138_v20 = vadd.f32 %v163_v18, %v137_v19 }
  0xff   :  { %v215_v21 = vpop.f32.mrf.mxu0 }
 0x100   :  { %223 = vtanh.f32 %v138_v20 }
 0x10d   :  { %v224_v23 = vpop.eup %223 }
 0x10e   :  { %v143_v24 = vmul.f32 10.0, %v224_v23 }
 0x110   :  { %v144_v25 = vadd.f32 %v143_v24, %v141_v22 }
 0x112   :  { %146 = vst [vmem:[#allocation8] sm:$0xff] %v144_v25 }
 0x113   :  { %276 = shalt.err (!%p273_p0)
}
 0x114   :  { %156 = dma.vmem_to_hbm [thread:$0]  %s154_s25, 128, %s333_s3, [#allocation5]  }
 0x115   :  { %289 = dma.done.wait [#allocation5], 128  }
 0x116   :  { %290 = vsyncadd [#allocation5], 4294967168 }
 0x117   :  { %160 = vsyncpa [#allocation4], 1 }
 0x118   :  { %161 = vsyncpa [#allocation7], 1 }
 0x119   :  { %162 = vsyncpa [#allocation5], 1 }

</bundles_post_ra>
